<compile_context>
chip_gen: v6e
topology: v6e:2x2x1
jax: 0.10.0
libtpu: 0.0.40
codegen_flags: <defaults>
</compile_context>

<pallas_src>
import functools

import jax
import jax.numpy as jnp
from jax.experimental import pallas as pl
from jax.experimental.pallas import tpu as pltpu

ALPHA = 0.2  # LeakyReLU negative slope of SpGraphAttentionLayer


# --------------------------------------------------------------------------
# Phase 1: fused projection  h_ext = x @ [W | W a1 | W a2 | 0...]
# --------------------------------------------------------------------------
def proj_kernel(x_ref, wext_ref, haug_ref, f12_ref, *, nclass):
    he = jnp.dot(x_ref[...], wext_ref[...],
                 preferred_element_type=jnp.float32)          # (TM, CE)
    col = jax.lax.broadcasted_iota(jnp.int32, he.shape, 1)
    # h_aug columns: [0:C] = h, [C] = 1.0 (rowsum rider), rest = 0
    haug = jnp.where(col < nclass, he,
                     jnp.where(col == nclass, 1.0, 0.0))
    haug_ref[...] = haug.astype(haug_ref.dtype)               # bf16
    f12_ref[...] = he[:, nclass:nclass + 2]                   # (TM, 2): [f1, f2] in f32


# --------------------------------------------------------------------------
# Phase 2: masked-exp attention + aggregation, tiled (i rows, j cols)
# --------------------------------------------------------------------------
def attn_kernel(f1_ref, f2_ref, adj_ref, haug_ref, out_ref, acc_ref,
                *, nclass, alpha):
    j = pl.program_id(1)

    @pl.when(j == 0)
    def _init():
        acc_ref[...] = jnp.zeros_like(acc_ref)

    # logits[i,j] = f1_i + f2_j   ((TM,1) + (1,TN) broadcast, no transpose)
    logits = f1_ref[...] + f2_ref[...]                        # (TM, TN) f32
    # exp(-leakyrelu(x)) == exp(x * (-1 if x>0 else -alpha))
    slope = jnp.where(logits > 0.0, -1.0, -alpha)
    e = jnp.exp(logits * slope) * adj_ref[...].astype(jnp.float32)   # masked edge weights
    # bf16 MXU pass, f32 accumulation; last real column of h_aug is the ones
    # column so acc[:, nclass] accumulates the rowsum for free.
    acc_ref[...] += jnp.dot(e.astype(jnp.bfloat16), haug_ref[...],
                            preferred_element_type=jnp.float32)

    @pl.when(j == pl.num_programs(1) - 1)
    def _finalize():
        acc = acc_ref[...]                                    # (TM, CE)
        inv = pl.reciprocal(acc[:, nclass:nclass + 1], approx=True)   # 1 / rowsum
        hp = acc * inv                                        # h_prime (+ junk pad cols)
        y = jnp.where(hp > 0.0, hp, jnp.exp(hp) - 1.0)        # ELU
        col = jax.lax.broadcasted_iota(jnp.int32, y.shape, 1)
        valid = col < nclass
        m = jnp.max(jnp.where(valid, y, -jnp.inf), axis=1, keepdims=True)
        ez = jnp.where(valid, jnp.exp(y - m), 0.0)
        lse = jnp.log(jnp.sum(ez, axis=1, keepdims=True))
        out_ref[...] = jnp.where(valid, y - m - lse, 0.0)     # lane-dense (TM, 128) store


def _pick_tile(n, target, quantum):
    """Largest multiple of `quantum` that divides `n` and is <= target, else n (full)."""
    if n <= target:
        return n
    t = (min(target, n) // quantum) * quantum
    while t >= quantum:
        if n % t == 0:
            return t
        t -= quantum
    return n


def spgat_forward(x, w, a, adj, *, alpha=ALPHA, block_m=512, block_n=2048):
    """x: (N, F), w: (F, C), a: (1, 2C), adj: (N, N) (nonzero pattern = edges)."""
    N, F = x.shape
    C = w.shape[1]
    CE = ((C + 2 + 127) // 128) * 128        # lane-padded width (>= C+2, multiple of 128)
    hi = jax.lax.Precision.HIGHEST

    x = x.astype(jnp.float32)
    w = w.astype(jnp.float32)
    a = a.astype(jnp.float32)
    a1 = a[0, :C].reshape(C, 1)
    a2 = a[0, C:].reshape(C, 1)

    # W_ext columns: [0:C] = W, [C] = W@a1, [C+1] = W@a2, rest = 0
    w_ext = jnp.zeros((F, CE), jnp.float32)
    w_ext = w_ext.at[:, :C].set(w)
    w_ext = w_ext.at[:, C].set(jnp.dot(w, a1, precision=hi)[:, 0])
    w_ext = w_ext.at[:, C + 1].set(jnp.dot(w, a2, precision=hi)[:, 0])

    # ---- phase 1: projection (row-tiled, independent tiles) ----
    tmp_rows = _pick_tile(N, 512, 8)
    h_aug, f12 = pl.pallas_call(
        functools.partial(proj_kernel, nclass=C),
        out_shape=(jax.ShapeDtypeStruct((N, CE), jnp.bfloat16),
                   jax.ShapeDtypeStruct((N, 2), jnp.float32)),
        grid=(N // tmp_rows,),
        in_specs=[
            pl.BlockSpec((tmp_rows, F), lambda i: (i, 0)),
            pl.BlockSpec((F, CE), lambda i: (0, 0)),
        ],
        out_specs=(
            pl.BlockSpec((tmp_rows, CE), lambda i: (i, 0)),
            pl.BlockSpec((tmp_rows, 2), lambda i: (i, 0)),
        ),
        compiler_params=pltpu.CompilerParams(
            dimension_semantics=("parallel",)),
    )(x, w_ext)

    # Layout plumbing only: f1 as (N,1) column, f2 as lane-major (1,N) row.
    f1 = f12[:, 0:1]
    f2_row = f12[:, 1].reshape(1, N)

    # ---- phase 2: tiled masked attention + aggregation ----
    tm = _pick_tile(N, block_m, 32)          # rows: multiple of 32 (int8 sublane packing)
    tn = _pick_tile(N, block_n, 128)         # cols: multiple of 128 (lane dim)
    adj_i8 = (adj != 0).astype(jnp.int8)     # stream the adjacency as int8 0/1 mask

    out_pad = pl.pallas_call(
        functools.partial(attn_kernel, nclass=C, alpha=alpha),
        out_shape=jax.ShapeDtypeStruct((N, CE), jnp.float32),
        grid=(N // tm, N // tn),
        in_specs=[
            pl.BlockSpec((tm, 1), lambda i, j: (i, 0)),      # f1 (row tile)
            pl.BlockSpec((1, tn), lambda i, j: (0, j)),      # f2 (col tile, lane-major)
            pl.BlockSpec((tm, tn), lambda i, j: (i, j)),     # adjacency mask (int8)
            pl.BlockSpec((tn, CE), lambda i, j: (j, 0)),     # h_aug RHS (bf16)
        ],
        out_specs=pl.BlockSpec((tm, CE), lambda i, j: (i, 0)),
        scratch_shapes=[pltpu.VMEM((tm, CE), jnp.float32)],
        compiler_params=pltpu.CompilerParams(
            dimension_semantics=("parallel", "arbitrary")),
    )(f1, f2_row, adj_i8, h_aug)

    return out_pad[:, :C]


# --------------------------------------------------------------------------
# Pure-JAX reference (same math as the PyTorch module, eval mode)
# --------------------------------------------------------------------------
def spgat_reference(x, w, a, adj, alpha=ALPHA):
    hi = jax.lax.Precision.HIGHEST
    x = x.astype(jnp.float32)
    w = w.astype(jnp.float32)
    a = a.astype(jnp.float32)
    C = w.shape[1]
    h = jnp.dot(x, w, precision=hi)
    f1 = jnp.dot(h, a[0, :C].reshape(C, 1), precision=hi)
    f2 = jnp.dot(h, a[0, C:].reshape(C, 1), precision=hi)
    logits = f1 + f2.T
    lrelu = jnp.where(logits > 0, logits, alpha * logits)
    e = jnp.exp(-lrelu) * (adj != 0).astype(jnp.float32)
    rowsum = jnp.sum(e, axis=1, keepdims=True)
    h_prime = jnp.dot(e, h, precision=hi) / rowsum
    y = jnp.where(h_prime > 0, h_prime, jnp.exp(h_prime) - 1.0)
    return jax.nn.log_softmax(y, axis=1)


def _xavier_normal(key, shape, gain):
    fan_in, fan_out = shape[0], shape[1]
    std = gain * jnp.sqrt(2.0 / (fan_in + fan_out))
    return std * jax.random.normal(key, shape, dtype=jnp.float32)


if __name__ == "__main__":
    # Small shapes consistent with the module; big enough to exercise a 2x2 tile grid.
    N, NFEAT, NCLASS = 256, 64, 16

    key = jax.random.PRNGKey(0)
    kx, kw, ka, kadj = jax.random.split(key, 4)

    # Deterministic parameter init (matches __init__ shapes; xavier_normal_ gain=1.414).
    W = _xavier_normal(kw, (NFEAT, NCLASS), gain=1.414)
    a = _xavier_normal(ka, (1, 2 * NCLASS), gain=1.414)

    # Node features and a dense adjacency with self-loops (so every row has an edge).
    x = jax.random.normal(kx, (N, NFEAT), dtype=jnp.float32)
    adj = (jax.random.uniform(kadj, (N, N)) > 0.7).astype(jnp.float32)
    adj = jnp.maximum(adj, jnp.eye(N, dtype=jnp.float32))

    # Small tiles so the (i rows x j cols) accumulation path is actually exercised.
    out = spgat_forward(x, W, a, adj, block_m=128, block_n=128)
    jax.block_until_ready(out)

    ref = spgat_reference(x, W, a, adj)

    assert out.shape == (N, NCLASS)
    assert bool(jnp.all(jnp.isfinite(out)))
    # log_softmax rows must sum to 1 in prob space
    assert bool(jnp.allclose(jnp.sum(jnp.exp(out), axis=1), 1.0, atol=1e-4))
    # match f32 reference (bf16 aggregation + approx reciprocal => loose tolerance)
    max_err = float(jnp.max(jnp.abs(out - ref)))
    assert max_err < 1e-1, f"max |out - ref| = {max_err}"

    print("KERNEL_OK")
</pallas_src>

<mosaic_0001>
module attributes {stable_mosaic.version = 11 : i64} {
  func.func @proj_kernel(%arg0: i32, %arg1: memref<256x64xf32, #tpu.memory_space<vmem>>, %arg2: memref<64x128xf32, #tpu.memory_space<vmem>>, %arg3: memref<256x128xbf16, #tpu.memory_space<vmem>>, %arg4: memref<256x2xf32, #tpu.memory_space<vmem>>) attributes {dimension_semantics = [#tpu.dimension_semantics<parallel>], iteration_bounds = array<i64: 1>, scalar_prefetch = 0 : i64, scratch_operands = 0 : i64, tpu.core_type = #tpu.core_type<tc>, window_params = [{transform_indices = @transform_0, window_bounds = array<i64: 256, 64>}, {pipeline_mode = #tpu.pipeline_mode<synchronous>, transform_indices = @transform_1, window_bounds = array<i64: 64, 128>}, {transform_indices = @transform_2, window_bounds = array<i64: 256, 128>}, {transform_indices = @transform_3, window_bounds = array<i64: 256, 2>}]} {
    %c0 = arith.constant 0 : index
    %c0_0 = arith.constant 0 : index
    %0 = vector.load %arg1[%c0, %c0_0] : memref<256x64xf32, #tpu.memory_space<vmem>>, vector<256x64xf32>
    %c0_1 = arith.constant 0 : index
    %c0_2 = arith.constant 0 : index
    %1 = vector.load %arg2[%c0_1, %c0_2] : memref<64x128xf32, #tpu.memory_space<vmem>>, vector<64x128xf32>
    %cst = arith.constant dense<0.000000e+00> : vector<256x128xf32>
    %2 = tpu.matmul %0, %1, %cst {dimension_numbers = #tpu.dot_dimension_numbers<[1], [0], [0], [1], [0, 0, 1, 1], [], []>} : vector<256x64xf32>, vector<64x128xf32>, vector<256x128xf32> -> vector<256x128xf32>
    %3 = tpu.iota {dimensions = array<i32: 1>} : vector<256x128xi32>
    %c16_i32 = arith.constant 16 : i32
    %4 = vector.broadcast %c16_i32 : i32 to vector<256x128xi32>
    %5 = arith.cmpi slt, %3, %4 : vector<256x128xi32>
    %c16_i32_3 = arith.constant 16 : i32
    %6 = vector.broadcast %c16_i32_3 : i32 to vector<256x128xi32>
    %7 = arith.cmpi eq, %3, %6 : vector<256x128xi32>
    %cst_4 = arith.constant 1.000000e+00 : f32
    %cst_5 = arith.constant 0.000000e+00 : f32
    %8 = vector.broadcast %cst_4 : f32 to vector<256x128xf32>
    %9 = vector.broadcast %cst_5 : f32 to vector<256x128xf32>
    %10 = arith.select %7, %8, %9 : vector<256x128xi1>, vector<256x128xf32>
    %11 = arith.select %5, %2, %10 : vector<256x128xi1>, vector<256x128xf32>
    %12 = arith.truncf %11 : vector<256x128xf32> to vector<256x128xbf16>
    %c0_6 = arith.constant 0 : index
    %c0_7 = arith.constant 0 : index
    %13 = vector.load %arg3[%c0_6, %c0_7] : memref<256x128xbf16, #tpu.memory_space<vmem>>, vector<256x128xbf16>
    tpu.vector_store %arg3[%c0_6, %c0_7], %12 {strides = array<i32>} : memref<256x128xbf16, #tpu.memory_space<vmem>>, vector<256x128xbf16>,
    %14 = vector.extract_strided_slice %2 {offsets = [0, 16], sizes = [256, 2], strides = [1, 1]} : vector<256x128xf32> to vector<256x2xf32>
    %c0_8 = arith.constant 0 : index
    %c0_9 = arith.constant 0 : index
    %15 = vector.load %arg4[%c0_8, %c0_9] : memref<256x2xf32, #tpu.memory_space<vmem>>, vector<256x2xf32>
    tpu.vector_store %arg4[%c0_8, %c0_9], %14 {strides = array<i32>} : memref<256x2xf32, #tpu.memory_space<vmem>>, vector<256x2xf32>,
    return
  }
  func.func @transform_0(%arg0: i32) -> (i32, i32) {
    %c0_i32 = arith.constant 0 : i32
    %c0_i32_0 = arith.constant 0 : i32
    return %arg0, %c0_i32 : i32, i32
  }
  func.func @transform_1(%arg0: i32) -> (i32, i32) {
    %c0_i32 = arith.constant 0 : i32
    %c0_i32_0 = arith.constant 0 : i32
    %c0_i32_1 = arith.constant 0 : i32
    return %c0_i32, %c0_i32_0 : i32, i32
  }
  func.func @transform_2(%arg0: i32) -> (i32, i32) {
    %c0_i32 = arith.constant 0 : i32
    %c0_i32_0 = arith.constant 0 : i32
    return %arg0, %c0_i32 : i32, i32
  }
  func.func @transform_3(%arg0: i32) -> (i32, i32) {
    %c0_i32 = arith.constant 0 : i32
    %c0_i32_0 = arith.constant 0 : i32
    return %arg0, %c0_i32 : i32, i32
  }
}

</mosaic_0001>

<bundles_post_ra>
// kernel: tpu_custom_call.1
= control target key start
LH: loop header
LB: loop body
LE: loop exit
PB: predicated region body
PF: predicated region fallthrough
CT: control target
= control target key end

     0   :  { %s1534_s0 = inlined_call_operand.vmem [shape: f32[256,64], index: 0, kind: input, shape index: {}]   ;;  %s1535_s1 = inlined_call_operand.vmem [shape: f32[64,128], index: 1, kind: input, shape index: {}]   ;;  %s1536_s2 = inlined_call_operand.hbm [shape: bf16[256,128], index: 2, kind: output, shape index: {0}]   ;;  %s1537_s3 = inlined_call_operand.vmem [shape: f32[256,2], index: 3, kind: output, shape index: {1}]  }
   0x1   :  { %v53_v0 = vld [vmem:[%s1535_s1 + $0x38] sm:$0xff]  ;;  %v52_v1 = vld [vmem:[%s1535_s1 + $0x30] sm:$0xff]  ;;  %v51_v2 = vld [vmem:[%s1535_s1 + $0x28] sm:$0xff] }
   0x2   :  { %985 = vmatprep.subr.mxu0 %v53_v0  ;;  %1049 = vmatprep.subr.mxu1 %v53_v0  ;;  %v50_v3 = vld [vmem:[%s1535_s1 + $0x20] sm:$0xff]  ;;  %v49_v4 = vld [vmem:[%s1535_s1 + $0x18] sm:$0xff]  ;;  %v48_v5 = vld [vmem:[%s1535_s1 + $0x10] sm:$0xff] }
   0x3   :  { %986 = vmatpush3.msra.mxu0 %v53_v0  ;;  %1057 = vmatpush3.msra.mxu1 %v53_v0  ;;  %v47_v6 = vld [vmem:[%s1535_s1 + $0x8] sm:$0xff]  ;;  %v46_v7 = vld [vmem:[%s1535_s1] sm:$0xff] }
   0x4   :  { %987 = vmatprep.subr.mxu0 %v52_v1  ;;  %1050 = vmatprep.subr.mxu1 %v52_v1 }
   0x5   :  { %988 = vmatpush3.msra.mxu0 %v52_v1  ;;  %1058 = vmatpush3.msra.mxu1 %v52_v1 }
   0x6   :  { %989 = vmatprep.subr.mxu0 %v51_v2  ;;  %1051 = vmatprep.subr.mxu1 %v51_v2 }
   0x7   :  { %990 = vmatpush3.msra.mxu0 %v51_v2  ;;  %1059 = vmatpush3.msra.mxu1 %v51_v2 }
   0x8   :  { %991 = vmatprep.subr.mxu0 %v50_v3  ;;  %1052 = vmatprep.subr.mxu1 %v50_v3 }
   0x9   :  { %992 = vmatpush3.msra.mxu0 %v50_v3  ;;  %1060 = vmatpush3.msra.mxu1 %v50_v3 }
   0xa   :  { %993 = vmatprep.subr.mxu0 %v49_v4  ;;  %1053 = vmatprep.subr.mxu1 %v49_v4 }
   0xb   :  { %994 = vmatpush3.msra.mxu0 %v49_v4  ;;  %1061 = vmatpush3.msra.mxu1 %v49_v4 }
   0xc   :  { %995 = vmatprep.subr.mxu0 %v48_v5  ;;  %1054 = vmatprep.subr.mxu1 %v48_v5 }
   0xd   :  { %996 = vmatpush3.msra.mxu0 %v48_v5  ;;  %1062 = vmatpush3.msra.mxu1 %v48_v5 }
   0xe   :  { %997 = vmatprep.subr.mxu0 %v47_v6  ;;  %1055 = vmatprep.subr.mxu1 %v47_v6 }
   0xf   :  { %9 = vsyncpa [#allocation3], 0  ;;  %998 = vmatpush3.msra.mxu0 %v47_v6  ;;  %1063 = vmatpush3.msra.mxu1 %v47_v6  ;;  %v14_v8 = vld [vmem:[%s1534_s0] sm:$0xff]  ;;  %vm54_vm0 = vcmask 523264   ;;  %v15_v10 = vld [vmem:[%s1534_s0 + $0x8] sm:$0xff]  ;;  %v376_v40 = vlaneseq  ;;  %v1092_v43 = vmov 0.0  }
  0x10   :  { %v30_v9 = vld [vmem:[%s1534_s0 + $0x80] sm:$0xff]  ;;  %999 = vmatprep.subr.mxu0 %v46_v7  ;;  %1056 = vmatprep.subr.mxu1 %v46_v7  ;;  %v31_v11 = vld [vmem:[%s1534_s0 + $0x88] sm:$0xff]  ;;  %v16_v12 = vld [vmem:[%s1534_s0 + $0x10] sm:$0xff]  ;;  %s1093_s8 = smov 112  }
  0x11   :  { %1000 = vmatpush3.msra.mxu0 %v46_v7  ;;  %1064 = vmatpush3.msra.mxu1 %v46_v7  ;;  %v32_v13 = vld [vmem:[%s1534_s0 + $0x90] sm:$0xff]  ;;  %v17_v14 = vld [vmem:[%s1534_s0 + $0x18] sm:$0xff]  ;;  %v18_v16 = vld [vmem:[%s1534_s0 + $0x20] sm:$0xff]  ;;  %v1269_v41 = vand.u32 127, %v376_v40 }
  0x12   :  { %1001 = vmatprep.mubr.msk.f32.mxu0 %vm54_vm0, %v14_v8  ;;  %1025 = vmatprep.mubr.msk.f32.mxu1 %vm54_vm0, %v30_v9  ;;  %v33_v15 = vld [vmem:[%s1534_s0 + $0x98] sm:$0xff]  ;;  %v34_v17 = vld [vmem:[%s1534_s0 + $0xa0] sm:$0xff]  ;;  %v19_v18 = vld [vmem:[%s1534_s0 + $0x28] sm:$0xff] }
  0x13   :  { %1002 = vmatmul.mubr.msk.f32.vlgmr.msra.gmra.mxu0 %vm54_vm0, %v15_v10  ;;  %1026 = vmatmul.mubr.msk.f32.vlgmr.msra.gmra.mxu1 %vm54_vm0, %v31_v11  ;;  %v35_v19 = vld [vmem:[%s1534_s0 + $0xa8] sm:$0xff]  ;;  %v20_v20 = vld [vmem:[%s1534_s0 + $0x30] sm:$0xff]  ;;  %v21_v22 = vld [vmem:[%s1534_s0 + $0x38] sm:$0xff]  ;;  %vm379_vm1 = vcmp.eq.s32.totalorder %v1269_v41, 16  ;;  %vm378_vm2 = vcmp.lt.s32.totalorder %v1269_v41, 16 }
  0x14   :  { %1004 = vmatprep.mubr.msk.f32.mxu0 %vm54_vm0, %v16_v12  ;;  %1028 = vmatprep.mubr.msk.f32.mxu1 %vm54_vm0, %v32_v13  ;;  %v36_v21 = vld [vmem:[%s1534_s0 + $0xb0] sm:$0xff]  ;;  %v37_v23 = vld [vmem:[%s1534_s0 + $0xb8] sm:$0xff]  ;;  %v22_v24 = vld [vmem:[%s1534_s0 + $0x40] sm:$0xff]  ;;  %v1273_v44 = vsel %vm379_vm1, 1.0, %v1092_v43 }
  0x15   :  { %v38_v25 = vld [vmem:[%s1534_s0 + $0xc0] sm:$0xff]  ;;  %v23_v26 = vld [vmem:[%s1534_s0 + $0x48] sm:$0xff]  ;;  %v24_v28 = vld [vmem:[%s1534_s0 + $0x50] sm:$0xff] }
  0x16   :  { %v39_v27 = vld [vmem:[%s1534_s0 + $0xc8] sm:$0xff]  ;;  %v40_v29 = vld [vmem:[%s1534_s0 + $0xd0] sm:$0xff]  ;;  %v25_v30 = vld [vmem:[%s1534_s0 + $0x58] sm:$0xff] }
  0x17   :  { %1005 = vmatmul.mubr.msk.f32.gmra.mxu0 %vm54_vm0, %v17_v14  ;;  %1029 = vmatmul.mubr.msk.f32.gmra.mxu1 %vm54_vm0, %v33_v15  ;;  %v41_v31 = vld [vmem:[%s1534_s0 + $0xd8] sm:$0xff]  ;;  %v26_v32 = vld [vmem:[%s1534_s0 + $0x60] sm:$0xff]  ;;  %v27_v34 = vld [vmem:[%s1534_s0 + $0x68] sm:$0xff] }
  0x18   :  { %1007 = vmatprep.mubr.msk.f32.mxu0 %vm54_vm0, %v18_v16  ;;  %1031 = vmatprep.mubr.msk.f32.mxu1 %vm54_vm0, %v34_v17  ;;  %v42_v33 = vld [vmem:[%s1534_s0 + $0xe0] sm:$0xff]  ;;  %v43_v35 = vld [vmem:[%s1534_s0 + $0xe8] sm:$0xff]  ;;  %v28_v36 = vld [vmem:[%s1534_s0 + $0x70] sm:$0xff] }
  0x19   :  { %v44_v37 = vld [vmem:[%s1534_s0 + $0xf0] sm:$0xff]  ;;  %v29_v38 = vld [vmem:[%s1534_s0 + $0x78] sm:$0xff] }
  0x1a   :  { %v45_v39 = vld [vmem:[%s1534_s0 + $0xf8] sm:$0xff]  ;;  %s1094_s0 = smov [#allocation2]  }
  0x1b   :  { %1008 = vmatmul.mubr.msk.f32.gmra.mxu0 %vm54_vm0, %v19_v18  ;;  %1032 = vmatmul.mubr.msk.f32.gmra.mxu1 %vm54_vm0, %v35_v19  ;;  %s739_s9 = sshll.u32 %s1094_s0, 4  ;;  %s740_s9 = int_to_ptr.vmem [resolvable:$true] %s739_s9 }
  0x1c   :  { %1010 = vmatprep.mubr.msk.f32.mxu0 %vm54_vm0, %v20_v20  ;;  %1034 = vmatprep.mubr.msk.f32.mxu1 %vm54_vm0, %v36_v21  ;;  %s1070_s10 = scalar_lea.vmem %s740_s9, 2048  ;;  %p1075_p1 = scmp.lt.s32.totalorder %s740_s9, %s740_s9 }
  0x1d   :  { %p1071_p0 = scmp.ne.s32.totalorder %s740_s9, %s1070_s10  ;;  %p1076_p2 = scmp.lt.s32.totalorder %s1070_s10, %s1070_s10 }
  0x1f   :  { %1011 = vmatmul.mubr.msk.f32.gmra.mxu0 %vm54_vm0, %v21_v22  ;;  %1035 = vmatmul.mubr.msk.f32.gmra.mxu1 %vm54_vm0, %v37_v23  ;;  %p1077_p3 = por %p1076_p2, %p1075_p1 }
  0x20   :  { %1013 = vmatprep.mubr.msk.f32.mxu0 %vm54_vm0, %v22_v24  ;;  %1037 = vmatprep.mubr.msk.f32.mxu1 %vm54_vm0, %v38_v25 }
  0x21   :  { %p1078_p4 = pnand %p1077_p3, %p1071_p0 }
  0x23   :  { %1014 = vmatmul.mubr.msk.f32.gmra.mxu0 %vm54_vm0, %v23_v26  ;;  %1038 = vmatmul.mubr.msk.f32.gmra.mxu1 %vm54_vm0, %v39_v27 }
  0x24   :  { %1016 = vmatprep.mubr.msk.f32.mxu0 %vm54_vm0, %v24_v28  ;;  %1040 = vmatprep.mubr.msk.f32.mxu1 %vm54_vm0, %v40_v29 }
  0x27   :  { %1017 = vmatmul.mubr.msk.f32.gmra.mxu0 %vm54_vm0, %v25_v30  ;;  %1041 = vmatmul.mubr.msk.f32.gmra.mxu1 %vm54_vm0, %v41_v31 }
  0x28   :  { %1019 = vmatprep.mubr.msk.f32.mxu0 %vm54_vm0, %v26_v32  ;;  %1043 = vmatprep.mubr.msk.f32.mxu1 %vm54_vm0, %v42_v33 }
  0x2b   :  { %1020 = vmatmul.mubr.msk.f32.gmra.mxu0 %vm54_vm0, %v27_v34  ;;  %1044 = vmatmul.mubr.msk.f32.gmra.mxu1 %vm54_vm0, %v43_v35 }
  0x2c   :  { %1022 = vmatprep.mubr.msk.f32.mxu0 %vm54_vm0, %v28_v36  ;;  %1046 = vmatprep.mubr.msk.f32.mxu1 %vm54_vm0, %v44_v37 }
  0x2f   :  { %1023 = vmatmul.mubr.msk.f32.gmra.mxu0 %vm54_vm0, %v29_v38  ;;  %1047 = vmatmul.mubr.msk.f32.gmra.mxu1 %vm54_vm0, %v45_v39 }
  0xd3   :  { %v1003_v42 = vpop.f32.mrf.mxu0  ;;  %v1027_v45 = vpop.f32.mrf.mxu1 }
  0xd4   :  { %639 = vrot.lane.b32.xlu1 %v1027_v45, %s1093_s8  ;;  %607 = vrot.lane.b32.xlu0 %v1003_v42, %s1093_s8  ;;  %v382_v48 = vsel %vm378_vm2, %v1003_v42, %v1273_v44  ;;  %v398_v49 = vsel %vm378_vm2, %v1027_v45, %v1273_v44 }
  0xd5   :  { %v217_v46 = vpop.f32.mrf.mxu0  ;;  %v297_v47 = vpop.f32.mrf.mxu1 }
  0xd6   :  { %v381_v50 = vsel %vm378_vm2, %v217_v46, %v1273_v44  ;;  %v397_v51 = vsel %vm378_vm2, %v297_v47, %v1273_v44 }
  0xd7   :  { %v853_v52 = vpack.c.bf16 %v382_v48, %v381_v50  ;;  %v893_v53 = vpack.c.bf16 %v398_v49, %v397_v51  ;;  %v1006_v54 = vpop.f32.mrf.mxu0  ;;  %v1030_v55 = vpop.f32.mrf.mxu1 }
  0xd8   :  { %605 = vrot.lane.b32.xlu0 %v217_v46, %s1093_s8  ;;  %611 = vrot.lane.b32.xlu1 %v1006_v54, %s1093_s8  ;;  %v400_v56 = vsel %vm378_vm2, %v1030_v55, %v1273_v44  ;;  %v384_v59 = vsel %vm378_vm2, %v1006_v54, %v1273_v44 }
  0xd9   :  { %854 = vst [vmem:[#allocation2] sm:$0xff] %v853_v52   ;;  %937 = vst [vmem:[#allocation2 + $0x40] sm:$0xff] %v893_v53   ;;  %v227_v57 = vpop.f32.mrf.mxu0  ;;  %v307_v58 = vpop.f32.mrf.mxu1 }
  0xda   :  { %v383_v60 = vsel %vm378_vm2, %v227_v57, %v1273_v44  ;;  %v399_v61 = vsel %vm378_vm2, %v307_v58, %v1273_v44 }
  0xdb   :  { %v858_v62 = vpack.c.bf16 %v384_v59, %v383_v60  ;;  %v898_v63 = vpack.c.bf16 %v400_v56, %v399_v61  ;;  %v1009_v0 = vpop.f32.mrf.mxu0  ;;  %v1033_v1 = vpop.f32.mrf.mxu1 }
  0xdc   :  { %637 = vrot.lane.b32.xlu0 %v297_v47, %s1093_s8  ;;  %643 = vrot.lane.b32.xlu1 %v1030_v55, %s1093_s8  ;;  %v386_v2 = vsel %vm378_vm2, %v1009_v0, %v1273_v44  ;;  %v402_v3 = vsel %vm378_vm2, %v1033_v1, %v1273_v44 }
  0xdd   :  { %930 = vst [vmem:[#allocation2 + $0x8] sm:$0xff] %v858_v62   ;;  %938 = vst [vmem:[#allocation2 + $0x48] sm:$0xff] %v898_v63   ;;  %v237_v4 = vpop.f32.mrf.mxu0  ;;  %v317_v5 = vpop.f32.mrf.mxu1 }
  0xde   :  { %v385_v6 = vsel %vm378_vm2, %v237_v4, %v1273_v44  ;;  %v401_v7 = vsel %vm378_vm2, %v317_v5, %v1273_v44 }
  0xdf   :  { %v863_v8 = vpack.c.bf16 %v386_v2, %v385_v6  ;;  %v903_v9 = vpack.c.bf16 %v402_v3, %v401_v7  ;;  %v1012_v10 = vpop.f32.mrf.mxu0  ;;  %v1036_v11 = vpop.f32.mrf.mxu1 }
  0xe0   :  { %641 = vrot.lane.b32.xlu0 %v307_v58, %s1093_s8  ;;  %609 = vrot.lane.b32.xlu1 %v227_v57, %s1093_s8  ;;  %v388_v12 = vsel %vm378_vm2, %v1012_v10, %v1273_v44  ;;  %v404_v13 = vsel %vm378_vm2, %v1036_v11, %v1273_v44 }
  0xe1   :  { %931 = vst [vmem:[#allocation2 + $0x10] sm:$0xff] %v863_v8   ;;  %939 = vst [vmem:[#allocation2 + $0x50] sm:$0xff] %v903_v9   ;;  %v247_v14 = vpop.f32.mrf.mxu0  ;;  %v327_v15 = vpop.f32.mrf.mxu1 }
  0xe2   :  { %v387_v16 = vsel %vm378_vm2, %v247_v14, %v1273_v44  ;;  %v403_v17 = vsel %vm378_vm2, %v327_v15, %v1273_v44 }
  0xe3   :  { %v868_v18 = vpack.c.bf16 %v388_v12, %v387_v16  ;;  %v908_v19 = vpack.c.bf16 %v404_v13, %v403_v17  ;;  %v1015_v20 = vpop.f32.mrf.mxu0  ;;  %v1039_v21 = vpop.f32.mrf.mxu1 }
  0xe4   :  { %615 = vrot.lane.b32.xlu1 %v1009_v0, %s1093_s8  ;;  %613 = vrot.lane.b32.xlu0 %v237_v4, %s1093_s8  ;;  %v390_v22 = vsel %vm378_vm2, %v1015_v20, %v1273_v44  ;;  %v406_v23 = vsel %vm378_vm2, %v1039_v21, %v1273_v44 }
  0xe5   :  { %932 = vst [vmem:[#allocation2 + $0x18] sm:$0xff] %v868_v18   ;;  %940 = vst [vmem:[#allocation2 + $0x58] sm:$0xff] %v908_v19   ;;  %v257_v24 = vpop.f32.mrf.mxu0  ;;  %v337_v25 = vpop.f32.mrf.mxu1 }
  0xe6   :  { %v389_v26 = vsel %vm378_vm2, %v257_v24, %v1273_v44  ;;  %v405_v27 = vsel %vm378_vm2, %v337_v25, %v1273_v44 }
  0xe7   :  { %v873_v28 = vpack.c.bf16 %v390_v22, %v389_v26  ;;  %v913_v29 = vpack.c.bf16 %v406_v23, %v405_v27  ;;  %v1018_v30 = vpop.f32.mrf.mxu0  ;;  %v1042_v31 = vpop.f32.mrf.mxu1 }
  0xe8   :  { %647 = vrot.lane.b32.xlu1 %v1033_v1, %s1093_s8  ;;  %645 = vrot.lane.b32.xlu0 %v317_v5, %s1093_s8  ;;  %v392_v32 = vsel %vm378_vm2, %v1018_v30, %v1273_v44  ;;  %v408_v33 = vsel %vm378_vm2, %v1042_v31, %v1273_v44 }
  0xe9   :  { %933 = vst [vmem:[#allocation2 + $0x20] sm:$0xff] %v873_v28   ;;  %941 = vst [vmem:[#allocation2 + $0x60] sm:$0xff] %v913_v29   ;;  %v267_v34 = vpop.f32.mrf.mxu0  ;;  %v347_v35 = vpop.f32.mrf.mxu1 }
  0xea   :  { %v391_v36 = vsel %vm378_vm2, %v267_v34, %v1273_v44  ;;  %v407_v37 = vsel %vm378_vm2, %v347_v35, %v1273_v44 }
  0xeb   :  { %v878_v38 = vpack.c.bf16 %v392_v32, %v391_v36  ;;  %v918_v39 = vpack.c.bf16 %v408_v33, %v407_v37  ;;  %v1021_v40 = vpop.f32.mrf.mxu0  ;;  %v1045_v42 = vpop.f32.mrf.mxu1 }
  0xec   :  { %619 = vrot.lane.b32.xlu1 %v1012_v10, %s1093_s8  ;;  %617 = vrot.lane.b32.xlu0 %v247_v14, %s1093_s8  ;;  %v394_v43 = vsel %vm378_vm2, %v1021_v40, %v1273_v44  ;;  %v410_v45 = vsel %vm378_vm2, %v1045_v42, %v1273_v44 }
  0xed   :  { %934 = vst [vmem:[#allocation2 + $0x28] sm:$0xff] %v878_v38   ;;  %942 = vst [vmem:[#allocation2 + $0x68] sm:$0xff] %v918_v39   ;;  %v277_v46 = vpop.f32.mrf.mxu0  ;;  %v357_v47 = vpop.f32.mrf.mxu1 }
  0xee   :  { %v393_v48 = vsel %vm378_vm2, %v277_v46, %v1273_v44  ;;  %v409_v49 = vsel %vm378_vm2, %v357_v47, %v1273_v44 }
  0xef   :  { %v883_v50 = vpack.c.bf16 %v394_v43, %v393_v48  ;;  %v923_v51 = vpack.c.bf16 %v410_v45, %v409_v49  ;;  %v1024_v52 = vpop.f32.mrf.mxu0  ;;  %v1048_v53 = vpop.f32.mrf.mxu1 }
  0xf0   :  { %651 = vrot.lane.b32.xlu1 %v1036_v11, %s1093_s8  ;;  %649 = vrot.lane.b32.xlu0 %v327_v15, %s1093_s8  ;;  %v396_v54 = vsel %vm378_vm2, %v1024_v52, %v1273_v44  ;;  %v412_v55 = vsel %vm378_vm2, %v1048_v53, %v1273_v44 }
  0xf1   :  { %935 = vst [vmem:[#allocation2 + $0x30] sm:$0xff] %v883_v50   ;;  %943 = vst [vmem:[#allocation2 + $0x70] sm:$0xff] %v923_v51   ;;  %v287_v56 = vpop.f32.mrf.mxu0  ;;  %v367_v57 = vpop.f32.mrf.mxu1 }
  0xf2   :  { %v395_v58 = vsel %vm378_vm2, %v287_v56, %v1273_v44  ;;  %v411_v59 = vsel %vm378_vm2, %v367_v57, %v1273_v44 }
  0xf3   :  { %v888_v60 = vpack.c.bf16 %v396_v54, %v395_v58  ;;  %v928_v61 = vpack.c.bf16 %v412_v55, %v411_v59 }
  0xf4   :  { %623 = vrot.lane.b32.xlu1 %v1015_v20, %s1093_s8  ;;  %621 = vrot.lane.b32.xlu0 %v257_v24, %s1093_s8 }
  0xf5   :  { %936 = vst [vmem:[#allocation2 + $0x38] sm:$0xff] %v888_v60   ;;  %944 = vst [vmem:[#allocation2 + $0x78] sm:$0xff] %v928_v61  }
  0xf8   :  { %655 = vrot.lane.b32.xlu1 %v1039_v21, %s1093_s8  ;;  %653 = vrot.lane.b32.xlu0 %v337_v25, %s1093_s8 }
  0xfc   :  { %627 = vrot.lane.b32.xlu1 %v1018_v30, %s1093_s8  ;;  %625 = vrot.lane.b32.xlu0 %v267_v34, %s1093_s8 }
 0x100   :  { %659 = vrot.lane.b32.xlu1 %v1042_v31, %s1093_s8  ;;  %657 = vrot.lane.b32.xlu0 %v347_v35, %s1093_s8 }
 0x104   :  { %631 = vrot.lane.b32.xlu1 %v1021_v40, %s1093_s8  ;;  %629 = vrot.lane.b32.xlu0 %v277_v46, %s1093_s8 }
 0x105   :  { %1081 = shalt.err (!%p1078_p4)
}
 0x106   :  { %s1095_s11 = smov 64   ;;  %s1096_s12 = smov 4   ;;  %vm701_vm3 = vcmask 15360  }
 0x107   :  { %745 = dma.vmem_to_hbm [thread:$0]  %s740_s9, 2048, %s1536_s2, [#allocation3], %s1095_s11, %s1095_s11, %s1096_s12  }
 0x108   :  { %663 = vrot.lane.b32.xlu1 %v1045_v42, %s1093_s8  ;;  %661 = vrot.lane.b32.xlu0 %v357_v47, %s1093_s8 }
 0x10c   :  { %635 = vrot.lane.b32.xlu1 %v1024_v52, %s1093_s8  ;;  %633 = vrot.lane.b32.xlu0 %v287_v56, %s1093_s8 }
 0x110   :  { %667 = vrot.lane.b32.xlu1 %v1048_v53, %s1093_s8  ;;  %665 = vrot.lane.b32.xlu0 %v367_v57, %s1093_s8 }
 0x146   :  { %v640_v41 = vpop.permute.xlu1 %639  ;;  %v608_v44 = vpop.permute.xlu0 %607 }
 0x147   :  { %719 = vst.msk [vmem:[%s1537_s3 + $0x88] sm:$0xff] %vm701_vm3, %v640_v41  ;;  %703 = vst.msk [vmem:[%s1537_s3 + $0x8] sm:$0xff] %vm701_vm3, %v608_v44 }
 0x14a   :  { %v606_v62 = vpop.permute.xlu0 %605  ;;  %v612_v63 = vpop.permute.xlu1 %611 }
 0x14b   :  { %702 = vst.msk [vmem:[%s1537_s3] sm:$0xff] %vm701_vm3, %v606_v62  ;;  %705 = vst.msk [vmem:[%s1537_s3 + $0x18] sm:$0xff] %vm701_vm3, %v612_v63 }
 0x14e   :  { %v638_v0 = vpop.permute.xlu0 %637  ;;  %v644_v1 = vpop.permute.xlu1 %643 }
 0x14f   :  { %718 = vst.msk [vmem:[%s1537_s3 + $0x80] sm:$0xff] %vm701_vm3, %v638_v0  ;;  %721 = vst.msk [vmem:[%s1537_s3 + $0x98] sm:$0xff] %vm701_vm3, %v644_v1 }
 0x152   :  { %v642_v2 = vpop.permute.xlu0 %641  ;;  %v610_v3 = vpop.permute.xlu1 %609 }
 0x153   :  { %720 = vst.msk [vmem:[%s1537_s3 + $0x90] sm:$0xff] %vm701_vm3, %v642_v2  ;;  %704 = vst.msk [vmem:[%s1537_s3 + $0x10] sm:$0xff] %vm701_vm3, %v610_v3 }
 0x156   :  { %v616_v4 = vpop.permute.xlu1 %615  ;;  %v614_v5 = vpop.permute.xlu0 %613 }
 0x157   :  { %707 = vst.msk [vmem:[%s1537_s3 + $0x28] sm:$0xff] %vm701_vm3, %v616_v4  ;;  %706 = vst.msk [vmem:[%s1537_s3 + $0x20] sm:$0xff] %vm701_vm3, %v614_v5 }
 0x15a   :  { %v648_v6 = vpop.permute.xlu1 %647  ;;  %v646_v7 = vpop.permute.xlu0 %645 }
 0x15b   :  { %723 = vst.msk [vmem:[%s1537_s3 + $0xa8] sm:$0xff] %vm701_vm3, %v648_v6  ;;  %722 = vst.msk [vmem:[%s1537_s3 + $0xa0] sm:$0xff] %vm701_vm3, %v646_v7 }
 0x15e   :  { %v620_v8 = vpop.permute.xlu1 %619  ;;  %v618_v9 = vpop.permute.xlu0 %617 }
 0x15f   :  { %709 = vst.msk [vmem:[%s1537_s3 + $0x38] sm:$0xff] %vm701_vm3, %v620_v8  ;;  %708 = vst.msk [vmem:[%s1537_s3 + $0x30] sm:$0xff] %vm701_vm3, %v618_v9 }
 0x162   :  { %v652_v10 = vpop.permute.xlu1 %651  ;;  %v650_v11 = vpop.permute.xlu0 %649 }
 0x163   :  { %725 = vst.msk [vmem:[%s1537_s3 + $0xb8] sm:$0xff] %vm701_vm3, %v652_v10  ;;  %724 = vst.msk [vmem:[%s1537_s3 + $0xb0] sm:$0xff] %vm701_vm3, %v650_v11 }
 0x166   :  { %v624_v12 = vpop.permute.xlu1 %623  ;;  %v622_v13 = vpop.permute.xlu0 %621 }
 0x167   :  { %711 = vst.msk [vmem:[%s1537_s3 + $0x48] sm:$0xff] %vm701_vm3, %v624_v12  ;;  %710 = vst.msk [vmem:[%s1537_s3 + $0x40] sm:$0xff] %vm701_vm3, %v622_v13 }
 0x16a   :  { %v656_v14 = vpop.permute.xlu1 %655  ;;  %v654_v15 = vpop.permute.xlu0 %653 }
 0x16b   :  { %727 = vst.msk [vmem:[%s1537_s3 + $0xc8] sm:$0xff] %vm701_vm3, %v656_v14  ;;  %726 = vst.msk [vmem:[%s1537_s3 + $0xc0] sm:$0xff] %vm701_vm3, %v654_v15 }
 0x16e   :  { %v628_v16 = vpop.permute.xlu1 %627  ;;  %v626_v17 = vpop.permute.xlu0 %625 }
 0x16f   :  { %713 = vst.msk [vmem:[%s1537_s3 + $0x58] sm:$0xff] %vm701_vm3, %v628_v16  ;;  %712 = vst.msk [vmem:[%s1537_s3 + $0x50] sm:$0xff] %vm701_vm3, %v626_v17 }
 0x172   :  { %v660_v18 = vpop.permute.xlu1 %659  ;;  %v658_v19 = vpop.permute.xlu0 %657 }
 0x173   :  { %729 = vst.msk [vmem:[%s1537_s3 + $0xd8] sm:$0xff] %vm701_vm3, %v660_v18  ;;  %728 = vst.msk [vmem:[%s1537_s3 + $0xd0] sm:$0xff] %vm701_vm3, %v658_v19 }
 0x176   :  { %v632_v20 = vpop.permute.xlu1 %631  ;;  %v630_v21 = vpop.permute.xlu0 %629 }
 0x177   :  { %715 = vst.msk [vmem:[%s1537_s3 + $0x68] sm:$0xff] %vm701_vm3, %v632_v20  ;;  %714 = vst.msk [vmem:[%s1537_s3 + $0x60] sm:$0xff] %vm701_vm3, %v630_v21 }
 0x17a   :  { %v664_v22 = vpop.permute.xlu1 %663  ;;  %v662_v23 = vpop.permute.xlu0 %661 }
 0x17b   :  { %731 = vst.msk [vmem:[%s1537_s3 + $0xe8] sm:$0xff] %vm701_vm3, %v664_v22  ;;  %730 = vst.msk [vmem:[%s1537_s3 + $0xe0] sm:$0xff] %vm701_vm3, %v662_v23 }
 0x17e   :  { %v636_v24 = vpop.permute.xlu1 %635  ;;  %v634_v25 = vpop.permute.xlu0 %633 }
 0x17f   :  { %717 = vst.msk [vmem:[%s1537_s3 + $0x78] sm:$0xff] %vm701_vm3, %v636_v24  ;;  %716 = vst.msk [vmem:[%s1537_s3 + $0x70] sm:$0xff] %vm701_vm3, %v634_v25 }
 0x182   :  { %v668_v26 = vpop.permute.xlu1 %667  ;;  %v666_v27 = vpop.permute.xlu0 %665 }
 0x183   :  { %733 = vst.msk [vmem:[%s1537_s3 + $0xf8] sm:$0xff] %vm701_vm3, %v668_v26  ;;  %732 = vst.msk [vmem:[%s1537_s3 + $0xf0] sm:$0xff] %vm701_vm3, %v666_v27 }
 0x184   :  { %1090 = dma.done.wait [#allocation3], 2048  }
 0x185   :  { %1091 = vsyncadd [#allocation3], 4294965248 }
 0x186   :  { %753 = vsyncpa [#allocation3], 1 }

</bundles_post_ra>
